<compile_context>
chip_gen: v5e
topology: v5e:2x2
jax: 0.10.0
libtpu: 0.0.40
codegen_flags: <defaults>
</compile_context>

<pallas_src>
import functools

import jax
import jax.numpy as jnp
from jax import lax
from jax.experimental import pallas as pl
from jax.experimental.pallas import tpu as pltpu


_VMEM_LIMIT = 48 * 1024 * 1024    # > default scoped limit, < v7x's 64 MiB/TC physical
_EPS = 1e-5


# ----------------------------------------------------------------------------
# Tiling helpers
# ----------------------------------------------------------------------------
def _round_up(x, m):
    return (x + m - 1) // m * m


def _choose_tm(m, max_tm=512):
    """128-aligned M tile, capped by a VMEM-friendly max; prefer >= 2 grid steps."""
    tm = min(max_tm, _round_up(m, 128))
    if tm > 128 and _round_up(m, tm) // tm < 2:
        tm = max(128, _round_up((m + 1) // 2, 128))
    return tm


def _choose_th(h, w, target_rows=512):
    """Row-tile height (multiple of 8) for the fused Bottleneck kernel."""
    th = max(8, min(_round_up(h, 8), (target_rows // max(w, 1)) // 8 * 8))
    while th > 8 and _round_up(h, th) // th < 2:
        th = max(8, (th // 2) // 8 * 8)
    return th


# ----------------------------------------------------------------------------
# Pallas kernels
# ----------------------------------------------------------------------------
def _conv1x1_kernel(x_ref, w_ref, s_ref, b_ref, o_ref):
    """1x1 conv (matmul over channels, bf16 in / f32 acc) + folded BN + Hardswish."""
    y = jnp.dot(x_ref[...], w_ref[...], preferred_element_type=jnp.float32)
    y = y * s_ref[...] + b_ref[...]
    y = y * jnp.clip(y + 3.0, 0.0, 6.0) * (1.0 / 6.0)
    o_ref[...] = y.astype(o_ref.dtype)


def _bottleneck_kernel(yp_hbm, mask_ref, w1_ref, s1_ref, b1_ref,
                       w9_ref, s2_ref, b2_ref, o_ref, ybuf, tbuf, sem,
                       *, th, w, wp, add):
    """Fused Bottleneck: cv1(1x1)+BN+hswish -> cv2(3x3)+BN+hswish (+ shortcut).

    The input lives in HBM as a flattened (N, (Hp+2)*Wp, Cin) view of the
    zero-padded NHWC activation; the (th+2)-row halo slab is DMA'd here.
    """
    b = pl.program_id(0)
    i = pl.program_id(1)

    # ---- manual halo DMA (contiguous slab in the flattened spatial view) ----
    cp = pltpu.make_async_copy(
        yp_hbm.at[b, pl.ds(i * th * wp, (th + 2) * wp)], ybuf, sem.at[0])
    cp.start()
    cp.wait()
    # TODO(synk): double-buffer this DMA across row tiles to hide its latency.

    # ---- cv1: 1x1 conv + folded BN + Hardswish on the whole halo tile (VMEM) ----
    t = jnp.dot(ybuf[...], w1_ref[...], preferred_element_type=jnp.float32)
    t = t * s1_ref[...] + b1_ref[...]
    t = t * jnp.clip(t + 3.0, 0.0, 6.0) * (1.0 / 6.0)
    t = t * mask_ref[...]            # zero the positions that are 3x3 SAME padding
    tbuf[...] = t

    # ---- cv2: 3x3 conv, one K = 9*cmid contraction per output row ----
    for p in range(th):
        tap = jnp.concatenate(
            [tbuf[(p + dy) * wp + dx:(p + dy) * wp + dx + w, :]
             for dy in range(3) for dx in range(3)],
            axis=-1)                                               # (w, 9*cmid) f32
        yr = jnp.dot(tap.astype(jnp.bfloat16), w9_ref[...],
                     preferred_element_type=jnp.float32)
        yr = yr * s2_ref[...] + b2_ref[...]
        yr = yr * jnp.clip(yr + 3.0, 0.0, 6.0) * (1.0 / 6.0)       # Hardswish
        if add:  # residual rows are already resident in VMEM (ybuf)
            yr = yr + ybuf[(p + 1) * wp + 1:(p + 1) * wp + 1 + w, :].astype(jnp.float32)
        o_ref[p * w:(p + 1) * w, :] = yr.astype(o_ref.dtype)


def _csp_tail_kernel(y_ref, x_ref, w3_ref, w2_ref, s1_ref, b1_ref, s2_ref, b2_ref,
                     w4a_ref, w4b_ref, s4_ref, b4_ref, o_ref):
    """Fused CSP tail: cv3 | cv2 | concat | BN | LeakyReLU(0.1) | cv4+BN+Hardswish."""
    y1 = jnp.dot(y_ref[...], w3_ref[...], preferred_element_type=jnp.float32)
    y2 = jnp.dot(x_ref[...], w2_ref[...], preferred_element_type=jnp.float32)
    z1 = y1 * s1_ref[...] + b1_ref[...]
    z1 = jnp.where(z1 >= 0.0, z1, 0.1 * z1)
    z2 = y2 * s2_ref[...] + b2_ref[...]
    z2 = jnp.where(z2 >= 0.0, z2, 0.1 * z2)
    # cv4 on the (virtual) channel concat, split into its two halves.
    o = (jnp.dot(z1.astype(jnp.bfloat16), w4a_ref[...], preferred_element_type=jnp.float32)
         + jnp.dot(z2.astype(jnp.bfloat16), w4b_ref[...], preferred_element_type=jnp.float32))
    o = o * s4_ref[...] + b4_ref[...]
    o_ref[...] = (o * jnp.clip(o + 3.0, 0.0, 6.0) * (1.0 / 6.0)).astype(o_ref.dtype)


# ----------------------------------------------------------------------------
# Kernel wrappers
# ----------------------------------------------------------------------------
def conv1x1_bn_hswish(x_nhwc, w_bf16, scale, bias):
    n, h, wd, cin = x_nhwc.shape
    cout = w_bf16.shape[1]
    m = n * h * wd
    tm = _choose_tm(m)
    mp = _round_up(m, tm)
    xm = x_nhwc.reshape(m, cin)
    if mp != m:
        xm = jnp.pad(xm, ((0, mp - m), (0, 0)))
    out = pl.pallas_call(
        _conv1x1_kernel,
        out_shape=jax.ShapeDtypeStruct((mp, cout), jnp.bfloat16),
        grid_spec=pltpu.PrefetchScalarGridSpec(
            num_scalar_prefetch=0,
            grid=(mp // tm,),
            in_specs=[
                pl.BlockSpec((tm, cin), lambda i: (i, 0)),
                pl.BlockSpec((cin, cout), lambda i: (0, 0)),
                pl.BlockSpec((1, cout), lambda i: (0, 0)),
                pl.BlockSpec((1, cout), lambda i: (0, 0)),
            ],
            out_specs=pl.BlockSpec((tm, cout), lambda i: (i, 0)),
        ),
        compiler_params=pltpu.CompilerParams(
            dimension_semantics=("parallel",), vmem_limit_bytes=_VMEM_LIMIT),
    )(xm, w_bf16, scale.reshape(1, cout), bias.reshape(1, cout))
    return out[:m].reshape(n, h, wd, cout)


def bottleneck_block(y, w1, s1, b1, w9, s2, b2, add):
    """One fused Bottleneck block (see _bottleneck_kernel)."""
    n, h, w, cin = y.shape
    cmid = w1.shape[1]
    cout = w9.shape[1]
    if add:
        assert cin == cout
    th = _choose_th(h, w)
    hp = _round_up(h, th)
    wp = w + 2
    n_tiles = hp // th

    # Zero-pad spatially by 1 (plus H round-up); pad positions are masked in-kernel.
    ypad = jnp.pad(y, ((0, 0), (1, hp - h + 1), (1, 1), (0, 0)))
    ypad = ypad.reshape(n, (hp + 2) * wp, cin)          # flat row-major spatial view

    # Per-row-tile mask that zeroes cv1 outputs at the 3x3 SAME-padding positions.
    rows = (jnp.arange(n_tiles)[:, None, None] * th
            + jnp.arange(th + 2)[None, :, None] - 1)
    cols = jnp.arange(wp)[None, None, :] - 1
    valid = (rows >= 0) & (rows < h) & (cols >= 0) & (cols < w)
    mask = valid.astype(jnp.float32).reshape(n_tiles, (th + 2) * wp, 1)

    out = pl.pallas_call(
        functools.partial(_bottleneck_kernel, th=th, w=w, wp=wp, add=add),
        out_shape=jax.ShapeDtypeStruct((n, hp * w, cout), jnp.bfloat16),
        grid_spec=pltpu.PrefetchScalarGridSpec(
            num_scalar_prefetch=0,
            grid=(n, n_tiles),
            in_specs=[
                pl.BlockSpec(memory_space=pl.ANY),                     # halo DMA'd manually
                pl.BlockSpec((None, (th + 2) * wp, 1), lambda b, i: (i, 0, 0)),
                pl.BlockSpec((cin, cmid), lambda b, i: (0, 0)),
                pl.BlockSpec((1, cmid), lambda b, i: (0, 0)),
                pl.BlockSpec((1, cmid), lambda b, i: (0, 0)),
                pl.BlockSpec((9 * cmid, cout), lambda b, i: (0, 0)),
                pl.BlockSpec((1, cout), lambda b, i: (0, 0)),
                pl.BlockSpec((1, cout), lambda b, i: (0, 0)),
            ],
            out_specs=pl.BlockSpec((None, th * w, cout), lambda b, i: (b, i, 0)),
            scratch_shapes=[
                pltpu.VMEM(((th + 2) * wp, cin), jnp.bfloat16),   # halo input slab
                pltpu.VMEM(((th + 2) * wp, cmid), jnp.float32),   # cv1 output (t)
                pltpu.SemaphoreType.DMA((1,)),
            ],
        ),
        compiler_params=pltpu.CompilerParams(
            dimension_semantics=("parallel", "parallel"),
            vmem_limit_bytes=_VMEM_LIMIT),
    )(ypad, mask, w1, s1.reshape(1, cmid), b1.reshape(1, cmid),
      w9, s2.reshape(1, cout), b2.reshape(1, cout))
    return out.reshape(n, hp, w, cout)[:, :h]


def csp_tail(y_nhwc, x_nhwc, w3, w2, bn_scale, bn_bias, w4, s4, b4):
    n, h, wd, c_ = y_nhwc.shape
    c1 = x_nhwc.shape[-1]
    c2 = w4.shape[1]
    m = n * h * wd
    tm = _choose_tm(m)
    mp = _round_up(m, tm)
    ym = y_nhwc.reshape(m, c_)
    xm = x_nhwc.reshape(m, c1)
    if mp != m:
        ym = jnp.pad(ym, ((0, mp - m), (0, 0)))
        xm = jnp.pad(xm, ((0, mp - m), (0, 0)))
    w4a, w4b = w4[:c_], w4[c_:]
    s1, s2 = bn_scale[:c_], bn_scale[c_:]
    b1, b2 = bn_bias[:c_], bn_bias[c_:]
    out = pl.pallas_call(
        _csp_tail_kernel,
        out_shape=jax.ShapeDtypeStruct((mp, c2), jnp.float32),
        grid_spec=pltpu.PrefetchScalarGridSpec(
            num_scalar_prefetch=0,
            grid=(mp // tm,),
            in_specs=[
                pl.BlockSpec((tm, c_), lambda i: (i, 0)),
                pl.BlockSpec((tm, c1), lambda i: (i, 0)),
                pl.BlockSpec((c_, c_), lambda i: (0, 0)),
                pl.BlockSpec((c1, c_), lambda i: (0, 0)),
                pl.BlockSpec((1, c_), lambda i: (0, 0)),
                pl.BlockSpec((1, c_), lambda i: (0, 0)),
                pl.BlockSpec((1, c_), lambda i: (0, 0)),
                pl.BlockSpec((1, c_), lambda i: (0, 0)),
                pl.BlockSpec((c_, c2), lambda i: (0, 0)),
                pl.BlockSpec((c_, c2), lambda i: (0, 0)),
                pl.BlockSpec((1, c2), lambda i: (0, 0)),
                pl.BlockSpec((1, c2), lambda i: (0, 0)),
            ],
            out_specs=pl.BlockSpec((tm, c2), lambda i: (i, 0)),
        ),
        compiler_params=pltpu.CompilerParams(
            dimension_semantics=("parallel",), vmem_limit_bytes=_VMEM_LIMIT),
    )(ym, xm, w3, w2, s1.reshape(1, c_), b1.reshape(1, c_),
      s2.reshape(1, c_), b2.reshape(1, c_), w4a, w4b,
      s4.reshape(1, c2), b4.reshape(1, c2))
    return out[:m].reshape(n, h, wd, c2)


# ----------------------------------------------------------------------------
# Parameter construction (deterministic, synthetic)
# ----------------------------------------------------------------------------
def _fold_bn(key, cout):
    kg, kb, km, kv = jax.random.split(key, 4)
    gamma = 1.0 + 0.1 * jax.random.normal(kg, (cout,), jnp.float32)
    beta = 0.1 * jax.random.normal(kb, (cout,), jnp.float32)
    mean = 0.05 * jax.random.normal(km, (cout,), jnp.float32)
    var = 0.9 + 0.1 * jnp.abs(jax.random.normal(kv, (cout,), jnp.float32))
    scale = gamma / jnp.sqrt(var + _EPS)
    bias = beta - mean * scale
    return scale, bias


def _init_conv_bn(key, cin, cout, k):
    kw, kbn = jax.random.split(key)
    w4 = 0.3 * jax.random.normal(kw, (k, k, cin, cout), jnp.float32)  # HWIO
    scale, bias = _fold_bn(kbn, cout)
    return dict(w4=w4, scale=scale, bias=bias)


def _init_plain_conv(key, cin, cout, k=1):
    return dict(w4=0.3 * jax.random.normal(key, (k, k, cin, cout), jnp.float32))


def make_params(key, c1, c2, n=1, shortcut=True, g=1, e=0.5):
    assert g == 1  # TODO(synk): grouped conv not implemented
    c_ = int(c2 * e)
    keys = jax.random.split(key, 6 + 2 * n)
    params = dict(
        cv1=_init_conv_bn(keys[0], c1, c_, 1),
        cv2=_init_plain_conv(keys[1], c1, c_, 1),
        cv3=_init_plain_conv(keys[2], c_, c_, 1),
        cv4=_init_conv_bn(keys[3], 2 * c_, c2, 1),
    )
    params["bn_scale"], params["bn_bias"] = _fold_bn(keys[4], 2 * c_)
    blocks = []
    for i in range(n):
        # Bottleneck(c_, c_, e=1.0): in == out channels, so `add` == shortcut.
        blocks.append(dict(
            cv1=_init_conv_bn(keys[5 + 2 * i], c_, c_, 1),
            cv2=_init_conv_bn(keys[6 + 2 * i], c_, c_, 3),
            add=bool(shortcut),
        ))
    params["m"] = blocks
    return params


# ----------------------------------------------------------------------------
# Forward passes
# ----------------------------------------------------------------------------
def _w2(w4):  # (1,1,Cin,Cout) -> (Cin,Cout)
    return w4[0, 0]


def pallas_bottleneck_csp(x_nchw, P):
    bf = jnp.bfloat16
    x = jnp.transpose(x_nchw, (0, 2, 3, 1)).astype(bf)      # NHWC, bf16 activations
    # cv1: 1x1 conv + BN + Hardswish
    y = conv1x1_bn_hswish(x, _w2(P["cv1"]["w4"]).astype(bf),
                          P["cv1"]["scale"], P["cv1"]["bias"])
    # m: n fused Bottleneck blocks
    for blk in P["m"]:
        w4 = blk["cv2"]["w4"]
        w9 = w4.reshape(9 * w4.shape[2], w4.shape[3]).astype(bf)
        y = bottleneck_block(y, _w2(blk["cv1"]["w4"]).astype(bf),
                             blk["cv1"]["scale"], blk["cv1"]["bias"],
                             w9, blk["cv2"]["scale"], blk["cv2"]["bias"],
                             blk["add"])
    # fused tail: cv3 | cv2 | concat | BN | LeakyReLU | cv4 in one kernel
    out = csp_tail(y, x,
                   _w2(P["cv3"]["w4"]).astype(bf), _w2(P["cv2"]["w4"]).astype(bf),
                   P["bn_scale"], P["bn_bias"],
                   _w2(P["cv4"]["w4"]).astype(bf), P["cv4"]["scale"], P["cv4"]["bias"])
    return jnp.transpose(out, (0, 3, 1, 2))                  # back to NCHW, f32


def ref_bottleneck_csp(x_nchw, P):
    """Pure-JAX reference with the same bf16-matmul / f32-accumulation semantics."""
    bf = jnp.bfloat16
    x = jnp.transpose(x_nchw, (0, 2, 3, 1)).astype(jnp.float32)

    def conv(v, w4):
        return lax.conv_general_dilated(
            v.astype(bf), w4.astype(bf), (1, 1), "SAME",
            dimension_numbers=("NHWC", "HWIO", "NHWC"),
            preferred_element_type=jnp.float32)

    def hsw(v):
        return v * jnp.clip(v + 3.0, 0.0, 6.0) / 6.0

    def q(v):  # bf16 storage of inter-layer activations (matches the kernels)
        return v.astype(bf).astype(jnp.float32)

    y = q(hsw(conv(x, P["cv1"]["w4"]) * P["cv1"]["scale"] + P["cv1"]["bias"]))
    for blk in P["m"]:
        t = hsw(conv(y, blk["cv1"]["w4"]) * blk["cv1"]["scale"] + blk["cv1"]["bias"])
        t = hsw(conv(t, blk["cv2"]["w4"]) * blk["cv2"]["scale"] + blk["cv2"]["bias"])
        y = q(y + t) if blk["add"] else q(t)
    y1 = conv(y, P["cv3"]["w4"])
    y2 = conv(x, P["cv2"]["w4"])
    z = jnp.concatenate([y1, y2], axis=-1) * P["bn_scale"] + P["bn_bias"]
    z = jnp.where(z >= 0.0, z, 0.1 * z)
    out = hsw(conv(z, P["cv4"]["w4"]) * P["cv4"]["scale"] + P["cv4"]["bias"])
    return jnp.transpose(out, (0, 3, 1, 2))


# ----------------------------------------------------------------------------
if __name__ == "__main__":
    key = jax.random.PRNGKey(0)
    kx, kp = jax.random.split(key)

    N, C1, C2, H, W = 2, 4, 4, 16, 16
    x = jax.random.normal(kx, (N, C1, H, W), jnp.float32)   # NCHW, like PyTorch
    params = make_params(kp, C1, C2, n=1, shortcut=True, g=1, e=0.5)

    out = jax.block_until_ready(pallas_bottleneck_csp(x, params))
    ref = jax.block_until_ready(ref_bottleneck_csp(x, params))

    assert out.shape == (N, C2, H, W), out.shape
    max_err = float(jnp.max(jnp.abs(out - ref)))
    # bf16 MXU inputs with f32 accumulation; reference mirrors the quantization
    # points, so the remaining delta is accumulation-order noise.
    assert max_err < 1e-2, f"max abs err {max_err}"
    print("KERNEL_OK")
</pallas_src>

<mosaic_0001>
module attributes {stable_mosaic.version = 11 : i64} {
  func.func @_conv1x1_kernel(%arg0: i32, %arg1: memref<256x4xbf16, #tpu.memory_space<vmem>>, %arg2: memref<4x2xbf16, #tpu.memory_space<vmem>>, %arg3: memref<1x2xf32, #tpu.memory_space<vmem>>, %arg4: memref<1x2xf32, #tpu.memory_space<vmem>>, %arg5: memref<256x2xbf16, #tpu.memory_space<vmem>>) attributes {dimension_semantics = [#tpu.dimension_semantics<parallel>], iteration_bounds = array<i64: 2>, scalar_prefetch = 0 : i64, scratch_operands = 0 : i64, tpu.core_type = #tpu.core_type<tc>, window_params = [{transform_indices = @transform_0, window_bounds = array<i64: 256, 4>}, {pipeline_mode = #tpu.pipeline_mode<synchronous>, transform_indices = @transform_1, window_bounds = array<i64: 4, 2>}, {pipeline_mode = #tpu.pipeline_mode<synchronous>, transform_indices = @transform_2, window_bounds = array<i64: 1, 2>}, {pipeline_mode = #tpu.pipeline_mode<synchronous>, transform_indices = @transform_3, window_bounds = array<i64: 1, 2>}, {transform_indices = @transform_4, window_bounds = array<i64: 256, 2>}]} {
    %c0 = arith.constant 0 : index
    %c0_0 = arith.constant 0 : index
    %0 = vector.load %arg1[%c0, %c0_0] : memref<256x4xbf16, #tpu.memory_space<vmem>>, vector<256x4xbf16>
    %c0_1 = arith.constant 0 : index
    %c0_2 = arith.constant 0 : index
    %1 = vector.load %arg2[%c0_1, %c0_2] : memref<4x2xbf16, #tpu.memory_space<vmem>>, vector<4x2xbf16>
    %cst = arith.constant dense<0.000000e+00> : vector<256x2xf32>
    %2 = tpu.matmul %0, %1, %cst {dimension_numbers = #tpu.dot_dimension_numbers<[1], [0], [0], [1], [0, 0, 1, 1], [], []>} : vector<256x4xbf16>, vector<4x2xbf16>, vector<256x2xf32> -> vector<256x2xf32>
    %c0_3 = arith.constant 0 : index
    %c0_4 = arith.constant 0 : index
    %3 = vector.load %arg3[%c0_3, %c0_4] : memref<1x2xf32, #tpu.memory_space<vmem>>, vector<1x2xf32>
    %4 = vector.broadcast %3 : vector<1x2xf32> to vector<256x2xf32>
    %5 = arith.mulf %2, %4 : vector<256x2xf32>
    %c0_5 = arith.constant 0 : index
    %c0_6 = arith.constant 0 : index
    %6 = vector.load %arg4[%c0_5, %c0_6] : memref<1x2xf32, #tpu.memory_space<vmem>>, vector<1x2xf32>
    %7 = vector.broadcast %6 : vector<1x2xf32> to vector<256x2xf32>
    %8 = arith.addf %5, %7 : vector<256x2xf32>
    %cst_7 = arith.constant 3.000000e+00 : f32
    %9 = vector.broadcast %cst_7 : f32 to vector<256x2xf32>
    %10 = arith.addf %8, %9 : vector<256x2xf32>
    %cst_8 = arith.constant 0.000000e+00 : f32
    %cst_9 = arith.constant 6.000000e+00 : f32
    %11 = vector.broadcast %cst_8 : f32 to vector<256x2xf32>
    %12 = arith.maximumf %11, %10 : vector<256x2xf32>
    %13 = vector.broadcast %cst_9 : f32 to vector<256x2xf32>
    %14 = arith.minimumf %13, %12 : vector<256x2xf32>
    %15 = arith.mulf %8, %14 : vector<256x2xf32>
    %cst_10 = arith.constant 0.166666672 : f32
    %16 = vector.broadcast %cst_10 : f32 to vector<256x2xf32>
    %17 = arith.mulf %15, %16 : vector<256x2xf32>
    %18 = arith.truncf %17 : vector<256x2xf32> to vector<256x2xbf16>
    %c0_11 = arith.constant 0 : index
    %c0_12 = arith.constant 0 : index
    %19 = vector.load %arg5[%c0_11, %c0_12] : memref<256x2xbf16, #tpu.memory_space<vmem>>, vector<256x2xbf16>
    tpu.vector_store %arg5[%c0_11, %c0_12], %18 {strides = array<i32>} : memref<256x2xbf16, #tpu.memory_space<vmem>>, vector<256x2xbf16>,
    return
  }
  func.func @transform_0(%arg0: i32) -> (i32, i32) {
    %c0_i32 = arith.constant 0 : i32
    %c0_i32_0 = arith.constant 0 : i32
    return %arg0, %c0_i32 : i32, i32
  }
  func.func @transform_1(%arg0: i32) -> (i32, i32) {
    %c0_i32 = arith.constant 0 : i32
    %c0_i32_0 = arith.constant 0 : i32
    %c0_i32_1 = arith.constant 0 : i32
    return %c0_i32, %c0_i32_0 : i32, i32
  }
  func.func @transform_2(%arg0: i32) -> (i32, i32) {
    %c0_i32 = arith.constant 0 : i32
    %c0_i32_0 = arith.constant 0 : i32
    %c0_i32_1 = arith.constant 0 : i32
    return %c0_i32, %c0_i32_0 : i32, i32
  }
  func.func @transform_3(%arg0: i32) -> (i32, i32) {
    %c0_i32 = arith.constant 0 : i32
    %c0_i32_0 = arith.constant 0 : i32
    %c0_i32_1 = arith.constant 0 : i32
    return %c0_i32, %c0_i32_0 : i32, i32
  }
  func.func @transform_4(%arg0: i32) -> (i32, i32) {
    %c0_i32 = arith.constant 0 : i32
    %c0_i32_0 = arith.constant 0 : i32
    return %arg0, %c0_i32 : i32, i32
  }
}

</mosaic_0001>

<bundles_post_ra>
// kernel: tpu_custom_call.1
= control target key start
LH: loop header
LB: loop body
LE: loop exit
PB: predicated region body
PF: predicated region fallthrough
CT: control target
= control target key end

     0   :  { %s963_s15 = smov 0   ;;  %s1146_s0 = inlined_call_operand.vmem [shape: bf16[512,4], index: 0, kind: input, shape index: {}]   ;;  %s1147_s1 = inlined_call_operand.vmem [shape: bf16[4,2], index: 1, kind: input, shape index: {}]   ;;  %s1148_s2 = inlined_call_operand.vmem [shape: f32[1,2], index: 2, kind: input, shape index: {}]   ;;  %s1149_s3 = inlined_call_operand.vmem [shape: f32[1,2], index: 3, kind: input, shape index: {}]   ;;  %s1150_s4 = inlined_call_operand.vmem [shape: bf16[512,2], index: 4, kind: output, shape index: {}]  }
   0x1 LB: > { %s810_s16 = sadd.s32 4294967295, %s936_s15   ;;  %p814_p0 = scmp.ge.s32.totalorder %s936_s15, 1  ;;  %s936_s15 = sphi %s963_s15, %s14_s15  }
   0x2   : > { %p163_p1 = scmp.lt.s32.totalorder %s936_s15, 3 }
   0x4   : > { %p164_p2 = pnand %p814_p0, %p163_p1 }
   0x5   : > { %s815_s19 = sshll.u32 (!%p164_p2), %s810_s16, 5 }
   0x6   : > { %167 = sbr.rel (%p164_p2) target bundleno = 223 (0xdf), region = 36  ;;  %p190_p3 = scmp.lt.s32.totalorder (!%p164_p2), %s815_s19, 63 }
   0xb   : > { %v234_v0 = vld [vmem:[%s1147_s1] sm:$0x3]  ;;  %vm364_vm0 = vcmask 1041408   ;;  %s1152_s19 = smov (!%p190_p3, %s815_s19), 63  ;;  %vm315_vm1 = vcmask 31744   ;;  %vm721_vm2 = vcmask 11264  }
   0xc   : > { %v366_v1 = vsel %vm364_vm0, %v234_v0, 0  ;;  %s816_s20 = sshll.u32 %s1152_s19, 2  ;;  %v1001_v18 = vld [vmem:[%s1148_s2] ss:$0 sm:$0xff] }
   0xd   : > { %375 = vmatpush.bf16.msra.mxu0 %v366_v1  ;;  %917 = vmatpush.bf16.msra.mxu1 %v366_v1  ;;  %s193_s23 = scalar_lea.vmem %s1146_s0, %s816_s20  ;;  %v1006_v19 = vld [vmem:[%s1149_s3] ss:$0 sm:$0xff]  ;;  %s1025_s30 = scalar_lea.vmem %s1150_s4, %s816_s20 }
   0xe   : > { %918 = vmatpush.bf16.msra.mxu2 %v366_v1  ;;  %919 = vmatpush.bf16.msra.mxu3 %v366_v1  ;;  %v901_v2 = vld [vmem:[%s193_s23] sm:$0xff]  ;;  %v902_v6 = vld [vmem:[%s193_s23 + $0x8] sm:$0xff]  ;;  %v903_v10 = vld [vmem:[%s193_s23 + $0x10] sm:$0xff] }
   0xf   : > { %v905_v3 = vld [vmem:[%s193_s23 + $0x20] sm:$0xff]  ;;  %v906_v7 = vld [vmem:[%s193_s23 + $0x28] sm:$0xff]  ;;  %v907_v11 = vld [vmem:[%s193_s23 + $0x30] sm:$0xff] }
  0x10   : > { %v909_v4 = vld [vmem:[%s193_s23 + $0x40] sm:$0xff]  ;;  %883 = vmatmul.msk.bf16.vlgmr.msra.gmra.mxu0 %vm315_vm1, %v901_v2  ;;  %887 = vmatmul.msk.bf16.vlgmr.msra.gmra.mxu1 %vm315_vm1, %v905_v3  ;;  %v910_v8 = vld [vmem:[%s193_s23 + $0x48] sm:$0xff]  ;;  %v911_v12 = vld [vmem:[%s193_s23 + $0x50] sm:$0xff] }
  0x11   : > { %v913_v5 = vld [vmem:[%s193_s23 + $0x60] sm:$0xff]  ;;  %891 = vmatmul.msk.bf16.vlgmr.msra.gmra.mxu2 %vm315_vm1, %v909_v4  ;;  %v914_v9 = vld [vmem:[%s193_s23 + $0x68] sm:$0xff]  ;;  %v915_v13 = vld [vmem:[%s193_s23 + $0x70] sm:$0xff] }
  0x12   : > { %895 = vmatmul.msk.bf16.vlgmr.msra.gmra.mxu3 %vm315_vm1, %v913_v5  ;;  %v904_v14 = vld [vmem:[%s193_s23 + $0x18] sm:$0xff] }
  0x13   : > { %v908_v15 = vld [vmem:[%s193_s23 + $0x38] sm:$0xff] }
  0x14   : > { %v912_v16 = vld [vmem:[%s193_s23 + $0x58] sm:$0xff] }
  0x15   : > { %v916_v17 = vld [vmem:[%s193_s23 + $0x78] sm:$0xff] }
  0x20   : > { %884 = vmatmul.msk.bf16.gmra.mxu0 %vm315_vm1, %v902_v6  ;;  %888 = vmatmul.msk.bf16.gmra.mxu1 %vm315_vm1, %v906_v7 }
  0x21   : > { %892 = vmatmul.msk.bf16.gmra.mxu2 %vm315_vm1, %v910_v8 }
  0x22   : > { %896 = vmatmul.msk.bf16.gmra.mxu3 %vm315_vm1, %v914_v9 }
  0x30   : > { %885 = vmatmul.msk.bf16.gmra.mxu0 %vm315_vm1, %v903_v10  ;;  %889 = vmatmul.msk.bf16.gmra.mxu1 %vm315_vm1, %v907_v11 }
  0x31   : > { %893 = vmatmul.msk.bf16.gmra.mxu2 %vm315_vm1, %v911_v12 }
  0x32   : > { %897 = vmatmul.msk.bf16.gmra.mxu3 %vm315_vm1, %v915_v13 }
  0x40   : > { %886 = vmatmul.msk.bf16.gmra.mxu0 %vm315_vm1, %v904_v14  ;;  %890 = vmatmul.msk.bf16.gmra.mxu1 %vm315_vm1, %v908_v15 }
  0x41   : > { %894 = vmatmul.msk.bf16.gmra.mxu2 %vm315_vm1, %v912_v16 }
  0x42   : > { %898 = vmatmul.msk.bf16.gmra.mxu3 %vm315_vm1, %v916_v17 }
  0x8d   : > { %v377_v20 = vpop.f32.mrf.mxu0  ;;  %v397_v21 = vpop.f32.mrf.mxu1 }
  0x8e   : > { %v461_v22 = vmul.f32 %v1001_v18, %v377_v20  ;;  %v469_v23 = vmul.f32 %v1001_v18, %v397_v21 }
  0x90   : > { %v497_v24 = vadd.f32 %v1006_v19, %v461_v22  ;;  %v505_v25 = vadd.f32 %v1006_v19, %v469_v23 }
  0x92   : > { %v529_v26 = vadd.f32 3.0, %v497_v24  ;;  %v537_v27 = vadd.f32 3.0, %v505_v25 }
  0x94   : > { %v561_v28 = vmax.f32 %v529_v26, 0.0  ;;  %v569_v29 = vmax.f32 %v537_v27, 0.0  ;;  %v417_v30 = vpop.f32.mrf.mxu2 }
  0x95   : > { %v437_v31 = vpop.f32.mrf.mxu3  ;;  %v477_v32 = vmul.f32 %v1001_v18, %v417_v30  ;;  %v379_v34 = vpop.f32.mrf.mxu0 }
  0x96   : > { %v485_v33 = vmul.f32 %v1001_v18, %v437_v31  ;;  %v399_v35 = vpop.f32.mrf.mxu1  ;;  %v593_v36 = vmin.f32 %v561_v28, 6.0  ;;  %v601_v37 = vmin.f32 %v569_v29, 6.0  ;;  %v462_v38 = vmul.f32 %v1001_v18, %v379_v34 }
  0x97   : > { %v470_v39 = vmul.f32 %v1001_v18, %v399_v35  ;;  %v513_v40 = vadd.f32 %v1006_v19, %v477_v32 }
  0x98   : > { %v521_v41 = vadd.f32 %v1006_v19, %v485_v33  ;;  %v625_v42 = vmul.f32 %v593_v36, %v497_v24  ;;  %v633_v43 = vmul.f32 %v601_v37, %v505_v25  ;;  %v498_v44 = vadd.f32 %v1006_v19, %v462_v38 }
  0x99   : > { %v506_v45 = vadd.f32 %v1006_v19, %v470_v39  ;;  %v545_v46 = vadd.f32 3.0, %v513_v40 }
  0x9a   : > { %v553_v47 = vadd.f32 3.0, %v521_v41  ;;  %v657_v48 = vmul.f32 0.16666667, %v625_v42  ;;  %v665_v49 = vmul.f32 0.16666667, %v633_v43  ;;  %v530_v50 = vadd.f32 3.0, %v498_v44 }
  0x9b   : > { %v538_v51 = vadd.f32 3.0, %v506_v45  ;;  %v577_v52 = vmax.f32 %v545_v46, 0.0 }
  0x9c   : > { %v585_v53 = vmax.f32 %v553_v47, 0.0  ;;  %v689_v54 = vpack.c.bf16 %v657_v48, %v657_v48  ;;  %v697_v55 = vpack.c.bf16 %v665_v49, %v665_v49  ;;  %v562_v56 = vmax.f32 %v530_v50, 0.0  ;;  %v419_v58 = vpop.f32.mrf.mxu2 }
  0x9d   : > { %v570_v57 = vmax.f32 %v538_v51, 0.0  ;;  %v439_v59 = vpop.f32.mrf.mxu3  ;;  %v609_v60 = vmin.f32 %v577_v52, 6.0  ;;  %v478_v62 = vmul.f32 %v1001_v18, %v419_v58  ;;  %v382_v0 = vpop.f32.mrf.mxu0 }
  0x9e   : > { %v617_v61 = vmin.f32 %v585_v53, 6.0  ;;  %v486_v63 = vmul.f32 %v1001_v18, %v439_v59  ;;  %v402_v1 = vpop.f32.mrf.mxu1  ;;  %722 = vst.msk [vmem:[%s1025_s30] sm:$0xf] %vm721_vm2, %v689_v54  ;;  %v594_v2 = vmin.f32 %v562_v56, 6.0  ;;  %v463_v4 = vmul.f32 %v1001_v18, %v382_v0 }
  0x9f   : > { %v602_v3 = vmin.f32 %v570_v57, 6.0  ;;  %v471_v5 = vmul.f32 %v1001_v18, %v402_v1  ;;  %730 = vst.msk [vmem:[%s1025_s30 + $0x20] sm:$0xf] %vm721_vm2, %v697_v55  ;;  %v641_v6 = vmul.f32 %v609_v60, %v513_v40  ;;  %v514_v8 = vadd.f32 %v1006_v19, %v478_v62 }
  0xa0   : > { %v649_v7 = vmul.f32 %v617_v61, %v521_v41  ;;  %v522_v9 = vadd.f32 %v1006_v19, %v486_v63  ;;  %v626_v10 = vmul.f32 %v594_v2, %v498_v44  ;;  %v499_v12 = vadd.f32 %v1006_v19, %v463_v4 }
  0xa1   : > { %v634_v11 = vmul.f32 %v602_v3, %v506_v45  ;;  %v507_v13 = vadd.f32 %v1006_v19, %v471_v5  ;;  %v673_v14 = vmul.f32 0.16666667, %v641_v6  ;;  %v546_v16 = vadd.f32 3.0, %v514_v8 }
  0xa2   : > { %v681_v15 = vmul.f32 0.16666667, %v649_v7  ;;  %v554_v17 = vadd.f32 3.0, %v522_v9  ;;  %v658_v20 = vmul.f32 0.16666667, %v626_v10  ;;  %v531_v22 = vadd.f32 3.0, %v499_v12 }
  0xa3   : > { %v666_v21 = vmul.f32 0.16666667, %v634_v11  ;;  %v539_v23 = vadd.f32 3.0, %v507_v13  ;;  %v705_v24 = vpack.c.bf16 %v673_v14, %v673_v14  ;;  %v578_v26 = vmax.f32 %v546_v16, 0.0 }
  0xa4   : > { %v713_v25 = vpack.c.bf16 %v681_v15, %v681_v15  ;;  %v586_v27 = vmax.f32 %v554_v17, 0.0  ;;  %v690_v28 = vpack.c.bf16 %v658_v20, %v658_v20  ;;  %v563_v30 = vmax.f32 %v531_v22, 0.0  ;;  %v422_v32 = vpop.f32.mrf.mxu2 }
  0xa5   : > { %v698_v29 = vpack.c.bf16 %v666_v21, %v666_v21  ;;  %v571_v31 = vmax.f32 %v539_v23, 0.0  ;;  %v442_v33 = vpop.f32.mrf.mxu3  ;;  %738 = vst.msk [vmem:[%s1025_s30 + $0x40] sm:$0xf] %vm721_vm2, %v705_v24  ;;  %v610_v34 = vmin.f32 %v578_v26, 6.0  ;;  %v479_v36 = vmul.f32 %v1001_v18, %v422_v32  ;;  %v384_v38 = vpop.f32.mrf.mxu0 }
  0xa6   : > { %v618_v35 = vmin.f32 %v586_v27, 6.0  ;;  %v487_v37 = vmul.f32 %v1001_v18, %v442_v33  ;;  %v404_v39 = vpop.f32.mrf.mxu1  ;;  %746 = vst.msk [vmem:[%s1025_s30 + $0x60] sm:$0xf] %vm721_vm2, %v713_v25  ;;  %v595_v40 = vmin.f32 %v563_v30, 6.0  ;;  %v464_v42 = vmul.f32 %v1001_v18, %v384_v38 }
  0xa7   : > { %v603_v41 = vmin.f32 %v571_v31, 6.0  ;;  %v472_v43 = vmul.f32 %v1001_v18, %v404_v39  ;;  %723 = vst.msk [vmem:[%s1025_s30 + $0x4] sm:$0xf] %vm721_vm2, %v690_v28  ;;  %v642_v44 = vmul.f32 %v610_v34, %v514_v8  ;;  %v515_v46 = vadd.f32 %v1006_v19, %v479_v36 }
  0xa8   : > { %v650_v45 = vmul.f32 %v618_v35, %v522_v9  ;;  %v523_v47 = vadd.f32 %v1006_v19, %v487_v37  ;;  %731 = vst.msk [vmem:[%s1025_s30 + $0x24] sm:$0xf] %vm721_vm2, %v698_v29  ;;  %v627_v48 = vmul.f32 %v595_v40, %v499_v12  ;;  %v500_v50 = vadd.f32 %v1006_v19, %v464_v42 }
  0xa9   : > { %v635_v49 = vmul.f32 %v603_v41, %v507_v13  ;;  %v508_v51 = vadd.f32 %v1006_v19, %v472_v43  ;;  %v674_v52 = vmul.f32 0.16666667, %v642_v44  ;;  %v547_v54 = vadd.f32 3.0, %v515_v46 }
  0xaa   : > { %v682_v53 = vmul.f32 0.16666667, %v650_v45  ;;  %v555_v55 = vadd.f32 3.0, %v523_v47  ;;  %v659_v56 = vmul.f32 0.16666667, %v627_v48  ;;  %v532_v58 = vadd.f32 3.0, %v500_v50 }
  0xab   : > { %v667_v57 = vmul.f32 0.16666667, %v635_v49  ;;  %v540_v59 = vadd.f32 3.0, %v508_v51  ;;  %v706_v60 = vpack.c.bf16 %v674_v52, %v674_v52  ;;  %v579_v62 = vmax.f32 %v547_v54, 0.0 }
  0xac   : > { %v714_v61 = vpack.c.bf16 %v682_v53, %v682_v53  ;;  %v587_v63 = vmax.f32 %v555_v55, 0.0  ;;  %v691_v0 = vpack.c.bf16 %v659_v56, %v659_v56  ;;  %v564_v2 = vmax.f32 %v532_v58, 0.0  ;;  %v424_v4 = vpop.f32.mrf.mxu2 }
  0xad   : > { %v699_v1 = vpack.c.bf16 %v667_v57, %v667_v57  ;;  %v572_v3 = vmax.f32 %v540_v59, 0.0  ;;  %v444_v5 = vpop.f32.mrf.mxu3  ;;  %739 = vst.msk [vmem:[%s1025_s30 + $0x44] sm:$0xf] %vm721_vm2, %v706_v60  ;;  %v611_v6 = vmin.f32 %v579_v62, 6.0  ;;  %v480_v8 = vmul.f32 %v1001_v18, %v424_v4  ;;  %v387_v10 = vpop.f32.mrf.mxu0 }
  0xae   : > { %v619_v7 = vmin.f32 %v587_v63, 6.0  ;;  %v488_v9 = vmul.f32 %v1001_v18, %v444_v5  ;;  %v407_v11 = vpop.f32.mrf.mxu1  ;;  %747 = vst.msk [vmem:[%s1025_s30 + $0x64] sm:$0xf] %vm721_vm2, %v714_v61  ;;  %v596_v12 = vmin.f32 %v564_v2, 6.0  ;;  %v465_v14 = vmul.f32 %v1001_v18, %v387_v10 }
  0xaf   : > { %v604_v13 = vmin.f32 %v572_v3, 6.0  ;;  %v473_v15 = vmul.f32 %v1001_v18, %v407_v11  ;;  %724 = vst.msk [vmem:[%s1025_s30 + $0x8] sm:$0xf] %vm721_vm2, %v691_v0  ;;  %v643_v16 = vmul.f32 %v611_v6, %v515_v46  ;;  %v516_v20 = vadd.f32 %v1006_v19, %v480_v8 }
  0xb0   : > { %v651_v17 = vmul.f32 %v619_v7, %v523_v47  ;;  %v524_v21 = vadd.f32 %v1006_v19, %v488_v9  ;;  %732 = vst.msk [vmem:[%s1025_s30 + $0x28] sm:$0xf] %vm721_vm2, %v699_v1  ;;  %v628_v22 = vmul.f32 %v596_v12, %v500_v50  ;;  %v501_v24 = vadd.f32 %v1006_v19, %v465_v14 }
  0xb1   : > { %v636_v23 = vmul.f32 %v604_v13, %v508_v51  ;;  %v509_v25 = vadd.f32 %v1006_v19, %v473_v15  ;;  %v675_v26 = vmul.f32 0.16666667, %v643_v16  ;;  %v548_v28 = vadd.f32 3.0, %v516_v20 }
  0xb2   : > { %v683_v27 = vmul.f32 0.16666667, %v651_v17  ;;  %v556_v29 = vadd.f32 3.0, %v524_v21  ;;  %v660_v30 = vmul.f32 0.16666667, %v628_v22  ;;  %v533_v32 = vadd.f32 3.0, %v501_v24 }
  0xb3   : > { %v668_v31 = vmul.f32 0.16666667, %v636_v23  ;;  %v541_v33 = vadd.f32 3.0, %v509_v25  ;;  %v707_v34 = vpack.c.bf16 %v675_v26, %v675_v26  ;;  %v580_v36 = vmax.f32 %v548_v28, 0.0 }
  0xb4   : > { %v715_v35 = vpack.c.bf16 %v683_v27, %v683_v27  ;;  %v588_v37 = vmax.f32 %v556_v29, 0.0  ;;  %v692_v38 = vpack.c.bf16 %v660_v30, %v660_v30  ;;  %v565_v40 = vmax.f32 %v533_v32, 0.0  ;;  %v427_v42 = vpop.f32.mrf.mxu2 }
  0xb5   : > { %v700_v39 = vpack.c.bf16 %v668_v31, %v668_v31  ;;  %v573_v41 = vmax.f32 %v541_v33, 0.0  ;;  %v447_v43 = vpop.f32.mrf.mxu3  ;;  %740 = vst.msk [vmem:[%s1025_s30 + $0x48] sm:$0xf] %vm721_vm2, %v707_v34  ;;  %v612_v44 = vmin.f32 %v580_v36, 6.0  ;;  %v481_v46 = vmul.f32 %v1001_v18, %v427_v42  ;;  %v389_v48 = vpop.f32.mrf.mxu0 }
  0xb6   : > { %v620_v45 = vmin.f32 %v588_v37, 6.0  ;;  %v489_v47 = vmul.f32 %v1001_v18, %v447_v43  ;;  %v409_v49 = vpop.f32.mrf.mxu1  ;;  %748 = vst.msk [vmem:[%s1025_s30 + $0x68] sm:$0xf] %vm721_vm2, %v715_v35  ;;  %v597_v50 = vmin.f32 %v565_v40, 6.0  ;;  %v466_v52 = vmul.f32 %v1001_v18, %v389_v48 }
  0xb7   : > { %v605_v51 = vmin.f32 %v573_v41, 6.0  ;;  %v474_v53 = vmul.f32 %v1001_v18, %v409_v49  ;;  %725 = vst.msk [vmem:[%s1025_s30 + $0xc] sm:$0xf] %vm721_vm2, %v692_v38  ;;  %v644_v54 = vmul.f32 %v612_v44, %v516_v20  ;;  %v517_v56 = vadd.f32 %v1006_v19, %v481_v46 }
  0xb8   : > { %v652_v55 = vmul.f32 %v620_v45, %v524_v21  ;;  %v525_v57 = vadd.f32 %v1006_v19, %v489_v47  ;;  %733 = vst.msk [vmem:[%s1025_s30 + $0x2c] sm:$0xf] %vm721_vm2, %v700_v39  ;;  %v629_v58 = vmul.f32 %v597_v50, %v501_v24  ;;  %v502_v60 = vadd.f32 %v1006_v19, %v466_v52 }
  0xb9   : > { %v637_v59 = vmul.f32 %v605_v51, %v509_v25  ;;  %v510_v61 = vadd.f32 %v1006_v19, %v474_v53  ;;  %v676_v62 = vmul.f32 0.16666667, %v644_v54  ;;  %v549_v0 = vadd.f32 3.0, %v517_v56 }
  0xba   : > { %v684_v63 = vmul.f32 0.16666667, %v652_v55  ;;  %v557_v1 = vadd.f32 3.0, %v525_v57  ;;  %v661_v2 = vmul.f32 0.16666667, %v629_v58  ;;  %v534_v4 = vadd.f32 3.0, %v502_v60 }
  0xbb   : > { %v669_v3 = vmul.f32 0.16666667, %v637_v59  ;;  %v542_v5 = vadd.f32 3.0, %v510_v61  ;;  %v708_v6 = vpack.c.bf16 %v676_v62, %v676_v62  ;;  %v581_v8 = vmax.f32 %v549_v0, 0.0 }
  0xbc   : > { %v716_v7 = vpack.c.bf16 %v684_v63, %v684_v63  ;;  %v589_v9 = vmax.f32 %v557_v1, 0.0  ;;  %v693_v10 = vpack.c.bf16 %v661_v2, %v661_v2  ;;  %v566_v12 = vmax.f32 %v534_v4, 0.0  ;;  %v429_v14 = vpop.f32.mrf.mxu2 }
  0xbd   : > { %v701_v11 = vpack.c.bf16 %v669_v3, %v669_v3  ;;  %v574_v13 = vmax.f32 %v542_v5, 0.0  ;;  %v449_v15 = vpop.f32.mrf.mxu3  ;;  %741 = vst.msk [vmem:[%s1025_s30 + $0x4c] sm:$0xf] %vm721_vm2, %v708_v6  ;;  %v613_v16 = vmin.f32 %v581_v8, 6.0  ;;  %v482_v20 = vmul.f32 %v1001_v18, %v429_v14  ;;  %v392_v22 = vpop.f32.mrf.mxu0 }
  0xbe   : > { %v621_v17 = vmin.f32 %v589_v9, 6.0  ;;  %v490_v21 = vmul.f32 %v1001_v18, %v449_v15  ;;  %v412_v23 = vpop.f32.mrf.mxu1  ;;  %749 = vst.msk [vmem:[%s1025_s30 + $0x6c] sm:$0xf] %vm721_vm2, %v716_v7  ;;  %v598_v24 = vmin.f32 %v566_v12, 6.0  ;;  %v467_v26 = vmul.f32 %v1001_v18, %v392_v22 }
  0xbf   : > { %v606_v25 = vmin.f32 %v574_v13, 6.0  ;;  %v475_v27 = vmul.f32 %v1001_v18, %v412_v23  ;;  %726 = vst.msk [vmem:[%s1025_s30 + $0x10] sm:$0xf] %vm721_vm2, %v693_v10  ;;  %v645_v28 = vmul.f32 %v613_v16, %v517_v56  ;;  %v518_v30 = vadd.f32 %v1006_v19, %v482_v20 }
  0xc0   : > { %v653_v29 = vmul.f32 %v621_v17, %v525_v57  ;;  %v526_v31 = vadd.f32 %v1006_v19, %v490_v21  ;;  %734 = vst.msk [vmem:[%s1025_s30 + $0x30] sm:$0xf] %vm721_vm2, %v701_v11  ;;  %v630_v32 = vmul.f32 %v598_v24, %v502_v60  ;;  %v503_v34 = vadd.f32 %v1006_v19, %v467_v26 }
  0xc1   : > { %v638_v33 = vmul.f32 %v606_v25, %v510_v61  ;;  %v511_v35 = vadd.f32 %v1006_v19, %v475_v27  ;;  %v677_v36 = vmul.f32 0.16666667, %v645_v28  ;;  %v550_v38 = vadd.f32 3.0, %v518_v30 }
  0xc2   : > { %v685_v37 = vmul.f32 0.16666667, %v653_v29  ;;  %v558_v39 = vadd.f32 3.0, %v526_v31  ;;  %v662_v40 = vmul.f32 0.16666667, %v630_v32  ;;  %v535_v42 = vadd.f32 3.0, %v503_v34 }
  0xc3   : > { %v670_v41 = vmul.f32 0.16666667, %v638_v33  ;;  %v543_v43 = vadd.f32 3.0, %v511_v35  ;;  %v709_v44 = vpack.c.bf16 %v677_v36, %v677_v36  ;;  %v582_v46 = vmax.f32 %v550_v38, 0.0 }
  0xc4   : > { %v717_v45 = vpack.c.bf16 %v685_v37, %v685_v37  ;;  %v590_v47 = vmax.f32 %v558_v39, 0.0  ;;  %v694_v48 = vpack.c.bf16 %v662_v40, %v662_v40  ;;  %v567_v50 = vmax.f32 %v535_v42, 0.0  ;;  %v432_v52 = vpop.f32.mrf.mxu2 }
  0xc5   : > { %v702_v49 = vpack.c.bf16 %v670_v41, %v670_v41  ;;  %v575_v51 = vmax.f32 %v543_v43, 0.0  ;;  %v452_v53 = vpop.f32.mrf.mxu3  ;;  %742 = vst.msk [vmem:[%s1025_s30 + $0x50] sm:$0xf] %vm721_vm2, %v709_v44  ;;  %v614_v54 = vmin.f32 %v582_v46, 6.0  ;;  %v483_v56 = vmul.f32 %v1001_v18, %v432_v52  ;;  %v394_v58 = vpop.f32.mrf.mxu0 }
  0xc6   : > { %v622_v55 = vmin.f32 %v590_v47, 6.0  ;;  %v491_v57 = vmul.f32 %v1001_v18, %v452_v53  ;;  %v414_v59 = vpop.f32.mrf.mxu1  ;;  %750 = vst.msk [vmem:[%s1025_s30 + $0x70] sm:$0xf] %vm721_vm2, %v717_v45  ;;  %v599_v60 = vmin.f32 %v567_v50, 6.0  ;;  %v468_v62 = vmul.f32 %v1001_v18, %v394_v58 }
  0xc7   : > { %v607_v61 = vmin.f32 %v575_v51, 6.0  ;;  %v476_v63 = vmul.f32 %v1001_v18, %v414_v59  ;;  %727 = vst.msk [vmem:[%s1025_s30 + $0x14] sm:$0xf] %vm721_vm2, %v694_v48  ;;  %v646_v0 = vmul.f32 %v614_v54, %v518_v30  ;;  %v519_v2 = vadd.f32 %v1006_v19, %v483_v56 }
  0xc8   : > { %v654_v1 = vmul.f32 %v622_v55, %v526_v31  ;;  %v527_v3 = vadd.f32 %v1006_v19, %v491_v57  ;;  %735 = vst.msk [vmem:[%s1025_s30 + $0x34] sm:$0xf] %vm721_vm2, %v702_v49  ;;  %v631_v4 = vmul.f32 %v599_v60, %v503_v34  ;;  %v504_v6 = vadd.f32 %v1006_v19, %v468_v62 }
  0xc9   : > { %v639_v5 = vmul.f32 %v607_v61, %v511_v35  ;;  %v512_v7 = vadd.f32 %v1006_v19, %v476_v63  ;;  %v678_v8 = vmul.f32 0.16666667, %v646_v0  ;;  %v551_v10 = vadd.f32 3.0, %v519_v2 }
  0xca   : > { %v686_v9 = vmul.f32 0.16666667, %v654_v1  ;;  %v559_v11 = vadd.f32 3.0, %v527_v3  ;;  %v663_v12 = vmul.f32 0.16666667, %v631_v4  ;;  %v536_v14 = vadd.f32 3.0, %v504_v6 }
  0xcb   : > { %v671_v13 = vmul.f32 0.16666667, %v639_v5  ;;  %v544_v15 = vadd.f32 3.0, %v512_v7  ;;  %v710_v16 = vpack.c.bf16 %v678_v8, %v678_v8  ;;  %v583_v20 = vmax.f32 %v551_v10, 0.0 }
  0xcc   : > { %v718_v17 = vpack.c.bf16 %v686_v9, %v686_v9  ;;  %v591_v21 = vmax.f32 %v559_v11, 0.0  ;;  %v695_v22 = vpack.c.bf16 %v663_v12, %v663_v12  ;;  %v568_v24 = vmax.f32 %v536_v14, 0.0  ;;  %v434_v26 = vpop.f32.mrf.mxu2 }
  0xcd   : > { %v703_v23 = vpack.c.bf16 %v671_v13, %v671_v13  ;;  %v576_v25 = vmax.f32 %v544_v15, 0.0  ;;  %v454_v27 = vpop.f32.mrf.mxu3  ;;  %743 = vst.msk [vmem:[%s1025_s30 + $0x54] sm:$0xf] %vm721_vm2, %v710_v16  ;;  %v615_v28 = vmin.f32 %v583_v20, 6.0  ;;  %v484_v30 = vmul.f32 %v1001_v18, %v434_v26 }
  0xce   : > { %v623_v29 = vmin.f32 %v591_v21, 6.0  ;;  %v492_v31 = vmul.f32 %v1001_v18, %v454_v27  ;;  %751 = vst.msk [vmem:[%s1025_s30 + $0x74] sm:$0xf] %vm721_vm2, %v718_v17  ;;  %v600_v32 = vmin.f32 %v568_v24, 6.0 }
  0xcf   : > { %v608_v33 = vmin.f32 %v576_v25, 6.0  ;;  %728 = vst.msk [vmem:[%s1025_s30 + $0x18] sm:$0xf] %vm721_vm2, %v695_v22  ;;  %v647_v34 = vmul.f32 %v615_v28, %v519_v2  ;;  %v520_v36 = vadd.f32 %v1006_v19, %v484_v30 }
  0xd0   : > { %v655_v35 = vmul.f32 %v623_v29, %v527_v3  ;;  %v528_v37 = vadd.f32 %v1006_v19, %v492_v31  ;;  %736 = vst.msk [vmem:[%s1025_s30 + $0x38] sm:$0xf] %vm721_vm2, %v703_v23  ;;  %v632_v38 = vmul.f32 %v600_v32, %v504_v6 }
  0xd1   : > { %v640_v39 = vmul.f32 %v608_v33, %v512_v7  ;;  %v679_v40 = vmul.f32 0.16666667, %v647_v34  ;;  %v552_v41 = vadd.f32 3.0, %v520_v36 }
  0xd2   : > { %v687_v18 = vmul.f32 0.16666667, %v655_v35  ;;  %v560_v42 = vadd.f32 3.0, %v528_v37  ;;  %v664_v43 = vmul.f32 0.16666667, %v632_v38 }
  0xd3   : > { %v672_v44 = vmul.f32 0.16666667, %v640_v39  ;;  %v711_v45 = vpack.c.bf16 %v679_v40, %v679_v40  ;;  %v584_v47 = vmax.f32 %v552_v41, 0.0 }
  0xd4   : > { %v719_v46 = vpack.c.bf16 %v687_v18, %v687_v18  ;;  %v592_v48 = vmax.f32 %v560_v42, 0.0  ;;  %v696_v19 = vpack.c.bf16 %v664_v43, %v664_v43 }
  0xd5   : > { %v704_v49 = vpack.c.bf16 %v672_v44, %v672_v44  ;;  %744 = vst.msk [vmem:[%s1025_s30 + $0x58] sm:$0xf] %vm721_vm2, %v711_v45  ;;  %v616_v50 = vmin.f32 %v584_v47, 6.0 }
  0xd6   : > { %v624_v51 = vmin.f32 %v592_v48, 6.0  ;;  %752 = vst.msk [vmem:[%s1025_s30 + $0x78] sm:$0xf] %vm721_vm2, %v719_v46 }
  0xd7   : > { %729 = vst.msk [vmem:[%s1025_s30 + $0x1c] sm:$0xf] %vm721_vm2, %v696_v19  ;;  %v648_v52 = vmul.f32 %v616_v50, %v520_v36 }
  0xd8   : > { %v656_v53 = vmul.f32 %v624_v51, %v528_v37  ;;  %737 = vst.msk [vmem:[%s1025_s30 + $0x3c] sm:$0xf] %vm721_vm2, %v704_v49 }
  0xd9   : > { %v680_v54 = vmul.f32 0.16666667, %v648_v52 }
  0xda   : > { %v688_v55 = vmul.f32 0.16666667, %v656_v53 }
  0xdb   : > { %v712_v56 = vpack.c.bf16 %v680_v54, %v680_v54 }
  0xdc   : > { %v720_v57 = vpack.c.bf16 %v688_v55, %v688_v55 }
  0xdd   : > { %745 = vst.msk [vmem:[%s1025_s30 + $0x5c] sm:$0xf] %vm721_vm2, %v712_v56 }
  0xde   : > { %753 = vst.msk [vmem:[%s1025_s30 + $0x7c] sm:$0xf] %vm721_vm2, %v720_v57 }
  0xdf PF: > { %s14_s15 = sadd.s32 1, %s936_s15  }
  0xe0   : > { %p11_p4 = scmp.ge.s32.totalorder %s14_s15, 4  }
  0xe2   :  { %13 = sbr.rel (!%p11_p4) target bundleno = 1 (0x1), region = 66 }

</bundles_post_ra>
